<compile_context>
chip_gen: v5e
topology: v5e:2x2
jax: 0.10.0
libtpu: 0.0.40
codegen_flags: <defaults>
</compile_context>

<pallas_src>
import numpy as np
import jax
import jax.numpy as jnp
from jax import lax
from jax.experimental import pallas as pl
from jax.experimental.pallas import tpu as pltpu


def adaptive_pool_matrix(in_size: int, out_size: int) -> np.ndarray:
    """Row-stochastic P (out, in) with P @ x == AdaptiveAvgPool1d(out)(x) (PyTorch bins)."""
    P = np.zeros((out_size, in_size), dtype=np.float32)
    for i in range(out_size):
        start = (i * in_size) // out_size
        end = -((-(i + 1) * in_size) // out_size)  # ceil((i+1)*in/out)
        P[i, start:end] = 1.0 / float(end - start)
    return P


def _tpu_defaults():
    """(vmem_capacity_bytes, num_tensorcores) with conservative fallbacks."""
    vmem_cap, num_tc = 64 << 20, 2  # v7x-safe defaults
    try:
        kind = jax.devices()[0].device_kind.lower()
        if "v7" in kind:
            vmem_cap, num_tc = 64 << 20, 2      # 2 TCs, 64 MiB VMEM per TC
        else:
            vmem_cap, num_tc = 128 << 20, 1     # v5e / v6e: 1 TC, 128 MiB VMEM
    except Exception:
        pass
    try:
        info = pltpu.get_tpu_info()
        vmem_cap = int(getattr(info, "vmem_capacity_bytes", vmem_cap))
    except Exception:
        pass
    return vmem_cap, num_tc


def _choose_batch_block(batch, per_image_bytes, fixed_bytes, vmem_budget, num_tc, max_bt):
    """Largest divisor of `batch` <= max_bt that fits the VMEM budget.

    On multi-TC chips (v7x) prefer an even number of >= 2 grid steps so the
    'parallel' grid axis keeps both TensorCores busy; on single-TC chips fewer,
    fatter steps are strictly better (amortize per-step pipeline overhead).
    """
    divisors = [d for d in range(1, batch + 1) if batch % d == 0]

    def fits(bt):
        return fixed_bytes + bt * per_image_bytes <= vmem_budget

    def steps_ok(bt):
        steps = batch // bt
        if num_tc <= 1:
            return True
        return steps >= 2 and steps % 2 == 0

    cands = [d for d in divisors if d <= max_bt and fits(d) and steps_ok(d)]
    if not cands:
        cands = [d for d in divisors if d <= max_bt and fits(d)]
    if not cands:
        cands = [1]
    return max(cands)


def encoder_kernel(x_ref, w_ref, p_ref, b_ref, o_ref, y_ref):
    # x_ref: (bt*HW, C)   bf16  NHWC-flattened feature block (streamed per step)
    # w_ref: (C, Dp)      bf16  1x1 conv weight, transposed, out-channels padded
    # p_ref: (SS, HW)     bf16  adaptive-avg-pool matrix (rows sum to 1)
    # b_ref: (1, Dp)      f32   conv bias (padded)
    # o_ref: (bt, SS, Dp) bf16  channels-last output block
    # y_ref: (bt*HW, Dp)  bf16  VMEM scratch: conv output for this block
    bt, ss, dp = o_ref.shape
    hw = p_ref.shape[1]

    # (1) One batched, lane-dense MXU matmul for the 1x1 conv (N = Dp >= 128).
    y = jnp.dot(x_ref[...], w_ref[...], preferred_element_type=jnp.float32)
    y_ref[...] = y.astype(jnp.bfloat16)

    p = p_ref[...]
    bias = jnp.broadcast_to(b_ref[...], (ss, dp))  # hoisted out of the per-image loop

    # (2) Adaptive pool per image; fori_loop bounds the live (SS, Dp) f32 temp
    #     to a single image (no static Python unroll -> no spilled live ranges).
    def body(b, carry):
        start = b * hw
        if hw % 8 == 0:
            start = pl.multiple_of(start, 8)  # sublane-aligned slice of the scratch
        y_b = y_ref[pl.ds(start, hw), :]                                  # (HW, Dp) bf16
        out_b = jnp.dot(p, y_b, preferred_element_type=jnp.float32)       # (SS, Dp) f32
        o_ref[b] = (out_b + bias).astype(o_ref.dtype)
        return carry

    lax.fori_loop(0, bt, body, 0)


def encoder_forward(features_nchw, conv_w, conv_b, enc_image_size, *, batch_block=None):
    """features_nchw: (B, C, H, W) backbone feature map (NCHW, like PyTorch).
    conv_w: (D, C) -- Conv2d(C, D, kernel_size=1) weight with the 1x1 dims squeezed.
    conv_b: (D,)   -- conv bias.
    Returns (B, S, S, D), i.e. out.permute(0, 2, 3, 1).
    """
    B, C, H, W = features_nchw.shape
    D = conv_w.shape[0]
    S = int(enc_image_size)
    HW, SS = H * W, S * S

    # Lane-dense output channels: pad encoder_dim up to a multiple of 128
    # (no-op for real encoder_dim = 512 / 2048; only inflates at toy scale).
    Dp = ((max(D, 128) + 127) // 128) * 128

    # Adaptive pool as one (SS, HW) matrix (kron of per-axis pooling matrices).
    p2 = jnp.asarray(np.kron(adaptive_pool_matrix(H, S), adaptive_pool_matrix(W, S)),
                     dtype=jnp.bfloat16)

    # Conv weight (D, C) -> (C, Dp) bf16 so the main matmul is (bt*HW, C) @ (C, Dp).
    w_pad = jnp.zeros((C, Dp), jnp.bfloat16).at[:, :D].set(conv_w.T.astype(jnp.bfloat16))
    b_pad = jnp.zeros((1, Dp), jnp.float32).at[0, :D].set(conv_b.astype(jnp.float32))

    # One-time NCHW -> NHWC transpose + flatten (single HBM pass, amortized by
    # the 2-4x better MXU utilization of the lane-dense main matmul); bf16 operands.
    x2 = jnp.transpose(features_nchw, (0, 2, 3, 1)).reshape(B * HW, C).astype(jnp.bfloat16)

    vmem_cap, num_tc = _tpu_defaults()

    # VMEM accounting (per review): double-buffered x / out streams, the f32
    # conv matmul result and its bf16 scratch copy, single-buffered constants.
    per_image = (2 * HW * C * 2          # x block (bf16, double-buffered)
                 + 2 * SS * Dp * 2       # output block (bf16, double-buffered)
                 + HW * Dp * 4           # f32 conv matmul result
                 + HW * Dp * 2)          # bf16 conv-output scratch
    fixed = (C * Dp * 2                  # conv weight (single-buffered)
             + SS * HW * 2               # pool matrix (single-buffered)
             + 8 * Dp * 4                # bias (sublane-padded)
             + 2 * SS * Dp * 4           # pooled f32 temp + hoisted bias broadcast
             + (4 << 20))                # compiler internal scratch / headroom

    if batch_block is None:
        max_bt = 8 if num_tc > 1 else 16  # v5e/v6e: fatter steps; v7x: keep 2 even steps
        bt = _choose_batch_block(B, per_image, fixed, int(0.8 * vmem_cap), num_tc, max_bt)
    else:
        bt = max(1, min(batch_block, B))
        while B % bt != 0:
            bt -= 1

    grid = (B // bt,)
    vmem_limit = int(min(max(fixed + bt * per_image, 32 << 20), int(0.9 * vmem_cap)))

    def build(single_buffer_consts):
        if single_buffer_consts:
            def const_spec(shape):
                # Grid-invariant operand: one buffer is enough (block never changes).
                return pl.BlockSpec(shape, lambda n: (0,) * len(shape),
                                    pipeline_mode=pl.Buffered(1))
        else:
            def const_spec(shape):
                return pl.BlockSpec(shape, lambda n: (0,) * len(shape))

        return pl.pallas_call(
            encoder_kernel,
            out_shape=jax.ShapeDtypeStruct((B, SS, Dp), jnp.bfloat16),  # bf16 writeback
            grid_spec=pltpu.PrefetchScalarGridSpec(
                num_scalar_prefetch=0,
                grid=grid,
                in_specs=[
                    pl.BlockSpec((bt * HW, C), lambda n: (n, 0)),  # streamed feature block
                    const_spec((C, Dp)),                           # conv weight (shared)
                    const_spec((SS, HW)),                          # pool matrix (shared)
                    const_spec((1, Dp)),                           # bias (shared)
                ],
                out_specs=pl.BlockSpec((bt, SS, Dp), lambda n: (n, 0, 0)),
                scratch_shapes=[pltpu.VMEM((bt * HW, Dp), jnp.bfloat16)],
            ),
            compiler_params=pltpu.CompilerParams(
                dimension_semantics=("parallel",),
                vmem_limit_bytes=vmem_limit,
            ),
        )

    try:
        out_flat = build(True)(x2, w_pad, p2, b_pad)
    except Exception:
        # Fallback for runtimes without single-buffered pipeline_mode support.
        out_flat = build(False)(x2, w_pad, p2, b_pad)

    # Drop channel padding, restore spatial dims and the module's dtype:
    # (B, S, S, D) == out.permute(0, 2, 3, 1). (Downstream attention can keep bf16
    # directly by skipping this cast.)
    return out_flat[:, :, :D].astype(features_nchw.dtype).reshape(B, S, S, D)


if __name__ == "__main__":
    # Small synthetic shapes consistent with the forward pass:
    #   B=2 images, C_IN=64 (stand-in for 2048 resnet channels), 16x16 feature map,
    #   enc_image_size=4 (stand-in for 14), encoder_dim=32.
    B, C_IN, H, W = 2, 64, 16, 16
    ENC_DIM, ENC_IMG = 32, 4

    key = jax.random.PRNGKey(0)
    k_feat, k_w, k_b = jax.random.split(key, 3)
    feats = jax.random.normal(k_feat, (B, C_IN, H, W), dtype=jnp.float32)
    conv_w = jax.random.normal(k_w, (ENC_DIM, C_IN), dtype=jnp.float32) * 0.05
    conv_b = jax.random.normal(k_b, (ENC_DIM,), dtype=jnp.float32) * 0.05

    out = encoder_forward(feats, conv_w, conv_b, ENC_IMG)
    out = jax.block_until_ready(out)

    # Pure-JAX f32 reference (adaptive avg pool -> 1x1 conv -> permute to NHWC).
    ph = jnp.asarray(adaptive_pool_matrix(H, ENC_IMG))
    pw = jnp.asarray(adaptive_pool_matrix(W, ENC_IMG))
    pooled_ref = jnp.einsum("ih,bchw,jw->bcij", ph, feats, pw)
    ref = jnp.einsum("bcij,dc->bijd", pooled_ref, conv_w) + conv_b

    assert out.shape == (B, ENC_IMG, ENC_IMG, ENC_DIM)
    # bf16 matmul operands / bf16 writeback (f32 accumulation) -> loose comparison.
    assert bool(jnp.allclose(out, ref, atol=2e-2, rtol=2e-2))
    print("KERNEL_OK")
</pallas_src>

<mosaic_0001>
module attributes {stable_mosaic.version = 11 : i64} {
  func.func @encoder_kernel(%arg0: i32, %arg1: memref<512x64xbf16, #tpu.memory_space<vmem>>, %arg2: memref<64x128xbf16, #tpu.memory_space<vmem>>, %arg3: memref<16x256xbf16, #tpu.memory_space<vmem>>, %arg4: memref<1x128xf32, #tpu.memory_space<vmem>>, %arg5: memref<2x16x128xbf16, #tpu.memory_space<vmem>>, %arg6: memref<512x128xbf16, #tpu.memory_space<vmem>>) attributes {dimension_semantics = [#tpu.dimension_semantics<parallel>], iteration_bounds = array<i64: 1>, scalar_prefetch = 0 : i64, scratch_operands = 1 : i64, tpu.core_type = #tpu.core_type<tc>, window_params = [{transform_indices = @transform_0, window_bounds = array<i64: 512, 64>}, {pipeline_mode = #tpu.pipeline_mode<synchronous>, transform_indices = @transform_1, window_bounds = array<i64: 64, 128>}, {pipeline_mode = #tpu.pipeline_mode<synchronous>, transform_indices = @transform_2, window_bounds = array<i64: 16, 256>}, {pipeline_mode = #tpu.pipeline_mode<synchronous>, transform_indices = @transform_3, window_bounds = array<i64: 1, 128>}, {transform_indices = @transform_4, window_bounds = array<i64: 2, 16, 128>}]} {
    %c0 = arith.constant 0 : index
    %c0_0 = arith.constant 0 : index
    %0 = vector.load %arg1[%c0, %c0_0] : memref<512x64xbf16, #tpu.memory_space<vmem>>, vector<512x64xbf16>
    %c0_1 = arith.constant 0 : index
    %c0_2 = arith.constant 0 : index
    %1 = vector.load %arg2[%c0_1, %c0_2] : memref<64x128xbf16, #tpu.memory_space<vmem>>, vector<64x128xbf16>
    %cst = arith.constant dense<0.000000e+00> : vector<512x128xf32>
    %2 = tpu.matmul %0, %1, %cst {dimension_numbers = #tpu.dot_dimension_numbers<[1], [0], [0], [1], [0, 0, 1, 1], [], []>} : vector<512x64xbf16>, vector<64x128xbf16>, vector<512x128xf32> -> vector<512x128xf32>
    %3 = arith.truncf %2 : vector<512x128xf32> to vector<512x128xbf16>
    %c0_3 = arith.constant 0 : index
    %c0_4 = arith.constant 0 : index
    %4 = vector.load %arg6[%c0_3, %c0_4] : memref<512x128xbf16, #tpu.memory_space<vmem>>, vector<512x128xbf16>
    tpu.vector_store %arg6[%c0_3, %c0_4], %3 {strides = array<i32>} : memref<512x128xbf16, #tpu.memory_space<vmem>>, vector<512x128xbf16>,
    %c0_5 = arith.constant 0 : index
    %c0_6 = arith.constant 0 : index
    %5 = vector.load %arg3[%c0_5, %c0_6] : memref<16x256xbf16, #tpu.memory_space<vmem>>, vector<16x256xbf16>
    %c0_7 = arith.constant 0 : index
    %c0_8 = arith.constant 0 : index
    %6 = vector.load %arg4[%c0_7, %c0_8] : memref<1x128xf32, #tpu.memory_space<vmem>>, vector<1x128xf32>
    %7 = vector.shape_cast %6 : vector<1x128xf32> to vector<1x128xf32>
    %8 = vector.broadcast %7 : vector<1x128xf32> to vector<16x128xf32>
    %c0_i32 = arith.constant 0 : i32
    %c2_i32 = arith.constant 2 : i32
    %9 = arith.addi %c0_i32, %c2_i32 : i32
    %c1_i32 = arith.constant 1 : i32
    scf.for %arg7 = %c0_i32 to %9 step %c1_i32  : i32 {
      %c256_i32 = arith.constant 256 : i32
      %10 = arith.muli %arg7, %c256_i32 : i32
      %11 = tpu.assume_multiple %10, 8 : i32
      %12 = arith.index_cast %11 : i32 to index
      %c0_10 = arith.constant 0 : index
      %13 = vector.load %arg6[%12, %c0_10] : memref<512x128xbf16, #tpu.memory_space<vmem>>, vector<256x128xbf16>
      %cst_11 = arith.constant dense<0.000000e+00> : vector<16x128xf32>
      %14 = tpu.matmul %5, %13, %cst_11 {dimension_numbers = #tpu.dot_dimension_numbers<[1], [0], [0], [1], [0, 0, 1, 1], [], []>} : vector<16x256xbf16>, vector<256x128xbf16>, vector<16x128xf32> -> vector<16x128xf32>
      %15 = arith.addf %14, %8 : vector<16x128xf32>
      %16 = arith.truncf %15 : vector<16x128xf32> to vector<16x128xbf16>
      %17 = arith.index_cast %arg7 : i32 to index
      %c0_12 = arith.constant 0 : index
      %c0_13 = arith.constant 0 : index
      %18 = vector.load %arg5[%17, %c0_12, %c0_13] : memref<2x16x128xbf16, #tpu.memory_space<vmem>>, vector<1x16x128xbf16>
      %19 = vector.shape_cast %18 : vector<1x16x128xbf16> to vector<16x128xbf16>
      %20 = vector.shape_cast %16 : vector<16x128xbf16> to vector<1x16x128xbf16>
      tpu.vector_store %arg5[%17, %c0_12, %c0_13], %20 {strides = array<i32>} : memref<2x16x128xbf16, #tpu.memory_space<vmem>>, vector<1x16x128xbf16>,
    }
    %c2_i32_9 = arith.constant 2 : i32
    return
  }
  func.func @transform_0(%arg0: i32) -> (i32, i32) {
    %c0_i32 = arith.constant 0 : i32
    %c0_i32_0 = arith.constant 0 : i32
    return %arg0, %c0_i32 : i32, i32
  }
  func.func @transform_1(%arg0: i32) -> (i32, i32) {
    %c0_i32 = arith.constant 0 : i32
    %c0_i32_0 = arith.constant 0 : i32
    %c0_i32_1 = arith.constant 0 : i32
    return %c0_i32, %c0_i32_0 : i32, i32
  }
  func.func @transform_2(%arg0: i32) -> (i32, i32) {
    %c0_i32 = arith.constant 0 : i32
    %c0_i32_0 = arith.constant 0 : i32
    %c0_i32_1 = arith.constant 0 : i32
    return %c0_i32, %c0_i32_0 : i32, i32
  }
  func.func @transform_3(%arg0: i32) -> (i32, i32) {
    %c0_i32 = arith.constant 0 : i32
    %c0_i32_0 = arith.constant 0 : i32
    %c0_i32_1 = arith.constant 0 : i32
    return %c0_i32, %c0_i32_0 : i32, i32
  }
  func.func @transform_4(%arg0: i32) -> (i32, i32, i32) {
    %c0_i32 = arith.constant 0 : i32
    %c0_i32_0 = arith.constant 0 : i32
    %c0_i32_1 = arith.constant 0 : i32
    return %arg0, %c0_i32, %c0_i32_0 : i32, i32, i32
  }
}

module attributes {stable_mosaic.version = 11 : i64} {
  func.func @encoder_kernel(%arg0: i32, %arg1: memref<512x64xbf16, #tpu.memory_space<vmem>>, %arg2: memref<64x128xbf16, #tpu.memory_space<vmem>>, %arg3: memref<16x256xbf16, #tpu.memory_space<vmem>>, %arg4: memref<1x128xf32, #tpu.memory_space<vmem>>, %arg5: memref<2x16x128xbf16, #tpu.memory_space<vmem>>, %arg6: memref<512x128xbf16, #tpu.memory_space<vmem>>) attributes {dimension_semantics = [#tpu.dimension_semantics<parallel>], iteration_bounds = array<i64: 1>, scalar_prefetch = 0 : i64, scratch_operands = 1 : i64, tpu.core_type = #tpu.core_type<tc>, window_params = [{transform_indices = @transform_0, window_bounds = array<i64: 512, 64>}, {pipeline_mode = #tpu.pipeline_mode<synchronous>, transform_indices = @transform_1, window_bounds = array<i64: 64, 128>}, {pipeline_mode = #tpu.pipeline_mode<synchronous>, transform_indices = @transform_2, window_bounds = array<i64: 16, 256>}, {pipeline_mode = #tpu.pipeline_mode<synchronous>, transform_indices = @transform_3, window_bounds = array<i64: 1, 128>}, {transform_indices = @transform_4, window_bounds = array<i64: 2, 16, 128>}]} {
    %c0 = arith.constant 0 : index
    %c0_0 = arith.constant 0 : index
    %0 = vector.load %arg1[%c0, %c0_0] : memref<512x64xbf16, #tpu.memory_space<vmem>>, vector<512x64xbf16>
    %c0_1 = arith.constant 0 : index
    %c0_2 = arith.constant 0 : index
    %1 = vector.load %arg2[%c0_1, %c0_2] : memref<64x128xbf16, #tpu.memory_space<vmem>>, vector<64x128xbf16>
    %cst = arith.constant dense<0.000000e+00> : vector<512x128xf32>
    %2 = tpu.matmul %0, %1, %cst {dimension_numbers = #tpu.dot_dimension_numbers<[1], [0], [0], [1], [0, 0, 1, 1], [], []>} : vector<512x64xbf16>, vector<64x128xbf16>, vector<512x128xf32> -> vector<512x128xf32>
    %3 = arith.truncf %2 : vector<512x128xf32> to vector<512x128xbf16>
    %c0_3 = arith.constant 0 : index
    %c0_4 = arith.constant 0 : index
    %4 = vector.load %arg6[%c0_3, %c0_4] : memref<512x128xbf16, #tpu.memory_space<vmem>>, vector<512x128xbf16>
    tpu.vector_store %arg6[%c0_3, %c0_4], %3 {strides = array<i32>} : memref<512x128xbf16, #tpu.memory_space<vmem>>, vector<512x128xbf16>,
    %c0_5 = arith.constant 0 : index
    %c0_6 = arith.constant 0 : index
    %5 = vector.load %arg3[%c0_5, %c0_6] : memref<16x256xbf16, #tpu.memory_space<vmem>>, vector<16x256xbf16>
    %c0_7 = arith.constant 0 : index
    %c0_8 = arith.constant 0 : index
    %6 = vector.load %arg4[%c0_7, %c0_8] : memref<1x128xf32, #tpu.memory_space<vmem>>, vector<1x128xf32>
    %7 = vector.shape_cast %6 : vector<1x128xf32> to vector<1x128xf32>
    %8 = vector.broadcast %7 : vector<1x128xf32> to vector<16x128xf32>
    %c0_i32 = arith.constant 0 : i32
    %c2_i32 = arith.constant 2 : i32
    %9 = arith.addi %c0_i32, %c2_i32 : i32
    %c1_i32 = arith.constant 1 : i32
    scf.for %arg7 = %c0_i32 to %9 step %c1_i32  : i32 {
      %c256_i32 = arith.constant 256 : i32
      %10 = arith.muli %arg7, %c256_i32 : i32
      %11 = tpu.assume_multiple %10, 8 : i32
      %12 = arith.index_cast %11 : i32 to index
      %c0_10 = arith.constant 0 : index
      %13 = vector.load %arg6[%12, %c0_10] : memref<512x128xbf16, #tpu.memory_space<vmem>>, vector<256x128xbf16>
      %cst_11 = arith.constant dense<0.000000e+00> : vector<16x128xf32>
      %14 = tpu.matmul %5, %13, %cst_11 {dimension_numbers = #tpu.dot_dimension_numbers<[1], [0], [0], [1], [0, 0, 1, 1], [], []>} : vector<16x256xbf16>, vector<256x128xbf16>, vector<16x128xf32> -> vector<16x128xf32>
      %15 = arith.addf %14, %8 : vector<16x128xf32>
      %16 = arith.truncf %15 : vector<16x128xf32> to vector<16x128xbf16>
      %17 = arith.index_cast %arg7 : i32 to index
      %c0_12 = arith.constant 0 : index
      %c0_13 = arith.constant 0 : index
      %18 = vector.load %arg5[%17, %c0_12, %c0_13] : memref<2x16x128xbf16, #tpu.memory_space<vmem>>, vector<1x16x128xbf16>
      %19 = vector.shape_cast %18 : vector<1x16x128xbf16> to vector<16x128xbf16>
      %20 = vector.shape_cast %16 : vector<16x128xbf16> to vector<1x16x128xbf16>
      tpu.vector_store %arg5[%17, %c0_12, %c0_13], %20 {strides = array<i32>} : memref<2x16x128xbf16, #tpu.memory_space<vmem>>, vector<1x16x128xbf16>,
    }
    %c2_i32_9 = arith.constant 2 : i32
    return
  }
  func.func @transform_0(%arg0: i32) -> (i32, i32) {
    %c0_i32 = arith.constant 0 : i32
    %c0_i32_0 = arith.constant 0 : i32
    return %arg0, %c0_i32 : i32, i32
  }
  func.func @transform_1(%arg0: i32) -> (i32, i32) {
    %c0_i32 = arith.constant 0 : i32
    %c0_i32_0 = arith.constant 0 : i32
    %c0_i32_1 = arith.constant 0 : i32
    return %c0_i32, %c0_i32_0 : i32, i32
  }
  func.func @transform_2(%arg0: i32) -> (i32, i32) {
    %c0_i32 = arith.constant 0 : i32
    %c0_i32_0 = arith.constant 0 : i32
    %c0_i32_1 = arith.constant 0 : i32
    return %c0_i32, %c0_i32_0 : i32, i32
  }
  func.func @transform_3(%arg0: i32) -> (i32, i32) {
    %c0_i32 = arith.constant 0 : i32
    %c0_i32_0 = arith.constant 0 : i32
    %c0_i32_1 = arith.constant 0 : i32
    return %c0_i32, %c0_i32_0 : i32, i32
  }
  func.func @transform_4(%arg0: i32) -> (i32, i32, i32) {
    %c0_i32 = arith.constant 0 : i32
    %c0_i32_0 = arith.constant 0 : i32
    %c0_i32_1 = arith.constant 0 : i32
    return %arg0, %c0_i32, %c0_i32_0 : i32, i32, i32
  }
}

</mosaic_0001>

<bundles_post_ra>
// kernel: tpu_custom_call.1
= control target key start
LH: loop header
LB: loop body
LE: loop exit
PB: predicated region body
PF: predicated region fallthrough
CT: control target
= control target key end

     0   :  { %9 = vsyncpa [#allocation4], 0  ;;  %vm275_vm0 = vcmask 523264   ;;  %s1659_s0 = inlined_call_operand.vmem [shape: bf16[512,64], index: 0, kind: input, shape index: {}]   ;;  %s1660_s1 = inlined_call_operand.vmem [shape: bf16[64,128], index: 1, kind: input, shape index: {}]   ;;  %s1661_s2 = inlined_call_operand.vmem [shape: bf16[16,256], index: 2, kind: input, shape index: {}]   ;;  %s1662_s3 = inlined_call_operand.vmem [shape: f32[1,128], index: 3, kind: input, shape index: {}]   ;;  %s1663_s4 = inlined_call_operand.hbm [shape: bf16[2,16,128], index: 4, kind: output, shape index: {}]  }
   0x1   :  { %v1173_v0 = vld [vmem:[%s1660_s1 + $0x18] sm:$0xff]  ;;  %v1172_v1 = vld [vmem:[%s1660_s1 + $0x10] sm:$0xff]  ;;  %v1171_v2 = vld [vmem:[%s1660_s1 + $0x8] sm:$0xff] }
   0x2   :  { %376 = vmatpush.bf16.msra.mxu0 %v1173_v0  ;;  %1389 = vmatpush.bf16.msra.mxu1 %v1173_v0  ;;  %v1170_v3 = vld [vmem:[%s1660_s1] sm:$0xff]  ;;  %v1139_v8 = vld [vmem:[%s1659_s0 + $0x8] sm:$0xff]  ;;  %v1140_v12 = vld [vmem:[%s1659_s0 + $0x10] sm:$0xff] }
   0x3   :  { %1390 = vmatpush.bf16.msra.mxu2 %v1173_v0  ;;  %1391 = vmatpush.bf16.msra.mxu3 %v1173_v0  ;;  %v1138_v4 = vld [vmem:[%s1659_s0] sm:$0xff]  ;;  %v1147_v9 = vld [vmem:[%s1659_s0 + $0x48] sm:$0xff]  ;;  %v1148_v13 = vld [vmem:[%s1659_s0 + $0x50] sm:$0xff] }
   0x4   :  { %v1146_v5 = vld [vmem:[%s1659_s0 + $0x40] sm:$0xff]  ;;  %v1155_v10 = vld [vmem:[%s1659_s0 + $0x88] sm:$0xff]  ;;  %v1156_v14 = vld [vmem:[%s1659_s0 + $0x90] sm:$0xff] }
   0x5   :  { %v1154_v6 = vld [vmem:[%s1659_s0 + $0x80] sm:$0xff]  ;;  %v1163_v11 = vld [vmem:[%s1659_s0 + $0xc8] sm:$0xff]  ;;  %v1164_v15 = vld [vmem:[%s1659_s0 + $0xd0] sm:$0xff] }
   0x6   :  { %377 = vmatpush.bf16.msra.mxu0 %v1172_v1  ;;  %1392 = vmatpush.bf16.msra.mxu1 %v1172_v1  ;;  %v1162_v7 = vld [vmem:[%s1659_s0 + $0xc0] sm:$0xff]  ;;  %v1141_v16 = vld [vmem:[%s1659_s0 + $0x18] sm:$0xff]  ;;  %v1143_v24 = vld [vmem:[%s1659_s0 + $0x28] sm:$0xff] }
   0x7   :  { %1393 = vmatpush.bf16.msra.mxu2 %v1172_v1  ;;  %1394 = vmatpush.bf16.msra.mxu3 %v1172_v1  ;;  %v1149_v17 = vld [vmem:[%s1659_s0 + $0x58] sm:$0xff]  ;;  %v1142_v20 = vld [vmem:[%s1659_s0 + $0x20] sm:$0xff]  ;;  %v1151_v25 = vld [vmem:[%s1659_s0 + $0x68] sm:$0xff] }
   0x8   :  { %v1157_v18 = vld [vmem:[%s1659_s0 + $0x98] sm:$0xff]  ;;  %v1150_v21 = vld [vmem:[%s1659_s0 + $0x60] sm:$0xff]  ;;  %v1159_v26 = vld [vmem:[%s1659_s0 + $0xa8] sm:$0xff] }
   0x9   :  { %v1165_v19 = vld [vmem:[%s1659_s0 + $0xd8] sm:$0xff]  ;;  %v1158_v22 = vld [vmem:[%s1659_s0 + $0xa0] sm:$0xff]  ;;  %v1167_v27 = vld [vmem:[%s1659_s0 + $0xe8] sm:$0xff] }
   0xa   :  { %378 = vmatpush.bf16.msra.mxu0 %v1171_v2  ;;  %1395 = vmatpush.bf16.msra.mxu1 %v1171_v2  ;;  %v1166_v23 = vld [vmem:[%s1659_s0 + $0xe0] sm:$0xff]  ;;  %v1144_v28 = vld [vmem:[%s1659_s0 + $0x30] sm:$0xff]  ;;  %v1145_v32 = vld [vmem:[%s1659_s0 + $0x38] sm:$0xff] }
   0xb   :  { %1396 = vmatpush.bf16.msra.mxu2 %v1171_v2  ;;  %1397 = vmatpush.bf16.msra.mxu3 %v1171_v2  ;;  %v1152_v29 = vld [vmem:[%s1659_s0 + $0x70] sm:$0xff]  ;;  %v1153_v33 = vld [vmem:[%s1659_s0 + $0x78] sm:$0xff] }
   0xc   :  { %v1160_v30 = vld [vmem:[%s1659_s0 + $0xb0] sm:$0xff]  ;;  %v1161_v34 = vld [vmem:[%s1659_s0 + $0xb8] sm:$0xff] }
   0xd   :  { %v1168_v31 = vld [vmem:[%s1659_s0 + $0xf0] sm:$0xff]  ;;  %v1169_v35 = vld [vmem:[%s1659_s0 + $0xf8] sm:$0xff] }
   0xe   :  { %379 = vmatpush.bf16.msra.mxu0 %v1170_v3  ;;  %1398 = vmatpush.bf16.msra.mxu1 %v1170_v3 }
   0xf   :  { %1399 = vmatpush.bf16.msra.mxu2 %v1170_v3  ;;  %1400 = vmatpush.bf16.msra.mxu3 %v1170_v3 }
  0x11   :  { %1030 = vmatmul.msk.bf16.vlgmr.msra.gmra.mxu0 %vm275_vm0, %v1138_v4  ;;  %1038 = vmatmul.msk.bf16.vlgmr.msra.gmra.mxu1 %vm275_vm0, %v1146_v5 }
  0x12   :  { %1046 = vmatmul.msk.bf16.vlgmr.msra.gmra.mxu2 %vm275_vm0, %v1154_v6  ;;  %1054 = vmatmul.msk.bf16.vlgmr.msra.gmra.mxu3 %vm275_vm0, %v1162_v7 }
  0x21   :  { %1031 = vmatmul.msk.bf16.gmra.mxu0 %vm275_vm0, %v1139_v8  ;;  %1039 = vmatmul.msk.bf16.gmra.mxu1 %vm275_vm0, %v1147_v9 }
  0x22   :  { %1047 = vmatmul.msk.bf16.gmra.mxu2 %vm275_vm0, %v1155_v10  ;;  %1055 = vmatmul.msk.bf16.gmra.mxu3 %vm275_vm0, %v1163_v11 }
  0x31   :  { %1032 = vmatmul.msk.bf16.gmra.mxu0 %vm275_vm0, %v1140_v12  ;;  %1040 = vmatmul.msk.bf16.gmra.mxu1 %vm275_vm0, %v1148_v13 }
  0x32   :  { %1048 = vmatmul.msk.bf16.gmra.mxu2 %vm275_vm0, %v1156_v14  ;;  %1056 = vmatmul.msk.bf16.gmra.mxu3 %vm275_vm0, %v1164_v15 }
  0x41   :  { %1033 = vmatmul.msk.bf16.gmra.mxu0 %vm275_vm0, %v1141_v16  ;;  %1041 = vmatmul.msk.bf16.gmra.mxu1 %vm275_vm0, %v1149_v17 }
  0x42   :  { %1049 = vmatmul.msk.bf16.gmra.mxu2 %vm275_vm0, %v1157_v18  ;;  %1057 = vmatmul.msk.bf16.gmra.mxu3 %vm275_vm0, %v1165_v19 }
  0x51   :  { %1034 = vmatmul.msk.bf16.gmra.mxu0 %vm275_vm0, %v1142_v20  ;;  %1042 = vmatmul.msk.bf16.gmra.mxu1 %vm275_vm0, %v1150_v21 }
  0x52   :  { %1050 = vmatmul.msk.bf16.gmra.mxu2 %vm275_vm0, %v1158_v22  ;;  %1058 = vmatmul.msk.bf16.gmra.mxu3 %vm275_vm0, %v1166_v23 }
  0x61   :  { %1035 = vmatmul.msk.bf16.gmra.mxu0 %vm275_vm0, %v1143_v24  ;;  %1043 = vmatmul.msk.bf16.gmra.mxu1 %vm275_vm0, %v1151_v25 }
  0x62   :  { %1051 = vmatmul.msk.bf16.gmra.mxu2 %vm275_vm0, %v1159_v26  ;;  %1059 = vmatmul.msk.bf16.gmra.mxu3 %vm275_vm0, %v1167_v27 }
  0x71   :  { %1036 = vmatmul.msk.bf16.gmra.mxu0 %vm275_vm0, %v1144_v28  ;;  %1044 = vmatmul.msk.bf16.gmra.mxu1 %vm275_vm0, %v1152_v29 }
  0x72   :  { %1052 = vmatmul.msk.bf16.gmra.mxu2 %vm275_vm0, %v1160_v30  ;;  %1060 = vmatmul.msk.bf16.gmra.mxu3 %vm275_vm0, %v1168_v31 }
  0x81   :  { %1037 = vmatmul.msk.bf16.gmra.mxu0 %vm275_vm0, %v1145_v32  ;;  %1045 = vmatmul.msk.bf16.gmra.mxu1 %vm275_vm0, %v1153_v33 }
  0x82   :  { %1053 = vmatmul.msk.bf16.gmra.mxu2 %vm275_vm0, %v1161_v34  ;;  %1061 = vmatmul.msk.bf16.gmra.mxu3 %vm275_vm0, %v1169_v35 }
  0x8e   :  { %v381_v36 = vpop.f32.mrf.mxu0  ;;  %v421_v37 = vpop.f32.mrf.mxu1 }
  0x95   :  { %v461_v38 = vpop.f32.mrf.mxu2  ;;  %v501_v39 = vpop.f32.mrf.mxu3 }
  0x96   :  { %v383_v40 = vpop.f32.mrf.mxu0  ;;  %v423_v41 = vpop.f32.mrf.mxu1 }
  0x97   :  { %v1196_v42 = vpack.c.bf16 %v383_v40, %v381_v36  ;;  %v1236_v43 = vpack.c.bf16 %v423_v41, %v421_v37 }
  0x99   :  { %1197 = vst [vmem:[#allocation2] sm:$0xff] %v1196_v42  }
  0x9a   :  { %1365 = vst [vmem:[#allocation2 + $0x40] sm:$0xff] %v1236_v43  }
  0x9d   :  { %v463_v44 = vpop.f32.mrf.mxu2  ;;  %v503_v45 = vpop.f32.mrf.mxu3 }
  0x9e   :  { %v1276_v46 = vpack.c.bf16 %v463_v44, %v461_v38  ;;  %v1316_v47 = vpack.c.bf16 %v503_v45, %v501_v39  ;;  %v386_v48 = vpop.f32.mrf.mxu0  ;;  %v426_v49 = vpop.f32.mrf.mxu1 }
  0xa0   :  { %1373 = vst [vmem:[#allocation2 + $0x80] sm:$0xff] %v1276_v46   ;;  %v1618_v46 = vld [vmem:[%s1661_s2 + $0x4] sm:$0xf] }
  0xa1   :  { %1381 = vst [vmem:[#allocation2 + $0xc0] sm:$0xff] %v1316_v47   ;;  %v1623_v47 = vld [vmem:[%s1661_s2] sm:$0xf] }
  0xa5   :  { %v466_v50 = vpop.f32.mrf.mxu2  ;;  %v506_v51 = vpop.f32.mrf.mxu3 }
  0xa6   :  { %v388_v52 = vpop.f32.mrf.mxu0  ;;  %v428_v53 = vpop.f32.mrf.mxu1 }
  0xa7   :  { %v1201_v54 = vpack.c.bf16 %v388_v52, %v386_v48  ;;  %v1241_v55 = vpack.c.bf16 %v428_v53, %v426_v49  ;;  %v1628_v48 = vld [vmem:[%s1661_s2 + $0x8] sm:$0xf0]  ;;  %v1633_v49 = vld [vmem:[%s1661_s2 + $0x4] sm:$0xf0]  ;;  %s1640_s2 = smov 0  }
  0xa9   :  { %1358 = vst [vmem:[#allocation2 + $0x8] sm:$0xff] %v1201_v54  }
  0xaa   :  { %1366 = vst [vmem:[#allocation2 + $0x48] sm:$0xff] %v1241_v55  }
  0xad   :  { %v468_v56 = vpop.f32.mrf.mxu2  ;;  %v508_v57 = vpop.f32.mrf.mxu3 }
  0xae   :  { %v1281_v58 = vpack.c.bf16 %v468_v56, %v466_v50  ;;  %v1321_v59 = vpack.c.bf16 %v508_v57, %v506_v51  ;;  %v391_v60 = vpop.f32.mrf.mxu0  ;;  %v431_v61 = vpop.f32.mrf.mxu1  ;;  %v1638_v50 = vld [vmem:[%s1662_s3] ss:$0 sm:$0xff] }
  0xb0   :  { %1374 = vst [vmem:[#allocation2 + $0x88] sm:$0xff] %v1281_v58  }
  0xb1   :  { %1382 = vst [vmem:[#allocation2 + $0xc8] sm:$0xff] %v1321_v59  }
  0xb5   :  { %v471_v62 = vpop.f32.mrf.mxu2  ;;  %v511_v63 = vpop.f32.mrf.mxu3 }
  0xb6   :  { %v393_v0 = vpop.f32.mrf.mxu0  ;;  %v433_v1 = vpop.f32.mrf.mxu1 }
  0xb7   :  { %v1206_v2 = vpack.c.bf16 %v393_v0, %v391_v60  ;;  %v1246_v3 = vpack.c.bf16 %v433_v1, %v431_v61 }
  0xb9   :  { %1359 = vst [vmem:[#allocation2 + $0x10] sm:$0xff] %v1206_v2  }
  0xba   :  { %1367 = vst [vmem:[#allocation2 + $0x50] sm:$0xff] %v1246_v3  }
  0xbd   :  { %v473_v4 = vpop.f32.mrf.mxu2  ;;  %v513_v5 = vpop.f32.mrf.mxu3 }
  0xbe   :  { %v1286_v6 = vpack.c.bf16 %v473_v4, %v471_v62  ;;  %v1326_v7 = vpack.c.bf16 %v513_v5, %v511_v63  ;;  %v396_v8 = vpop.f32.mrf.mxu0  ;;  %v436_v9 = vpop.f32.mrf.mxu1 }
  0xc0   :  { %1375 = vst [vmem:[#allocation2 + $0x90] sm:$0xff] %v1286_v6  }
  0xc1   :  { %1383 = vst [vmem:[#allocation2 + $0xd0] sm:$0xff] %v1326_v7  }
  0xc5   :  { %v476_v10 = vpop.f32.mrf.mxu2  ;;  %v516_v11 = vpop.f32.mrf.mxu3 }
  0xc6   :  { %v398_v12 = vpop.f32.mrf.mxu0  ;;  %v438_v13 = vpop.f32.mrf.mxu1 }
  0xc7   :  { %v1211_v14 = vpack.c.bf16 %v398_v12, %v396_v8  ;;  %v1251_v15 = vpack.c.bf16 %v438_v13, %v436_v9 }
  0xc9   :  { %1360 = vst [vmem:[#allocation2 + $0x18] sm:$0xff] %v1211_v14  }
  0xca   :  { %1368 = vst [vmem:[#allocation2 + $0x58] sm:$0xff] %v1251_v15  }
  0xcd   :  { %v478_v16 = vpop.f32.mrf.mxu2  ;;  %v518_v17 = vpop.f32.mrf.mxu3 }
  0xce   :  { %v1291_v18 = vpack.c.bf16 %v478_v16, %v476_v10  ;;  %v1331_v19 = vpack.c.bf16 %v518_v17, %v516_v11  ;;  %v401_v20 = vpop.f32.mrf.mxu0  ;;  %v441_v21 = vpop.f32.mrf.mxu1 }
  0xd0   :  { %1376 = vst [vmem:[#allocation2 + $0x98] sm:$0xff] %v1291_v18  }
  0xd1   :  { %1384 = vst [vmem:[#allocation2 + $0xd8] sm:$0xff] %v1331_v19  }
  0xd5   :  { %v481_v22 = vpop.f32.mrf.mxu2  ;;  %v521_v23 = vpop.f32.mrf.mxu3 }
  0xd6   :  { %v403_v24 = vpop.f32.mrf.mxu0  ;;  %v443_v25 = vpop.f32.mrf.mxu1 }
  0xd7   :  { %v1216_v26 = vpack.c.bf16 %v403_v24, %v401_v20  ;;  %v1256_v27 = vpack.c.bf16 %v443_v25, %v441_v21 }
  0xd9   :  { %1361 = vst [vmem:[#allocation2 + $0x20] sm:$0xff] %v1216_v26  }
  0xda   :  { %1369 = vst [vmem:[#allocation2 + $0x60] sm:$0xff] %v1256_v27  }
  0xdd   :  { %v483_v28 = vpop.f32.mrf.mxu2  ;;  %v523_v29 = vpop.f32.mrf.mxu3 }
  0xde   :  { %v1296_v30 = vpack.c.bf16 %v483_v28, %v481_v22  ;;  %v1336_v31 = vpack.c.bf16 %v523_v29, %v521_v23  ;;  %v406_v32 = vpop.f32.mrf.mxu0  ;;  %v446_v33 = vpop.f32.mrf.mxu1 }
  0xe0   :  { %1377 = vst [vmem:[#allocation2 + $0xa0] sm:$0xff] %v1296_v30  }
  0xe1   :  { %1385 = vst [vmem:[#allocation2 + $0xe0] sm:$0xff] %v1336_v31  }
  0xe5   :  { %v486_v34 = vpop.f32.mrf.mxu2  ;;  %v526_v35 = vpop.f32.mrf.mxu3 }
  0xe6   :  { %v408_v36 = vpop.f32.mrf.mxu0  ;;  %v448_v37 = vpop.f32.mrf.mxu1 }
  0xe7   :  { %v1221_v38 = vpack.c.bf16 %v408_v36, %v406_v32  ;;  %v1261_v39 = vpack.c.bf16 %v448_v37, %v446_v33 }
  0xe9   :  { %1362 = vst [vmem:[#allocation2 + $0x28] sm:$0xff] %v1221_v38  }
  0xea   :  { %1370 = vst [vmem:[#allocation2 + $0x68] sm:$0xff] %v1261_v39  }
  0xed   :  { %v488_v40 = vpop.f32.mrf.mxu2  ;;  %v528_v41 = vpop.f32.mrf.mxu3 }
  0xee   :  { %v1301_v42 = vpack.c.bf16 %v488_v40, %v486_v34  ;;  %v1341_v43 = vpack.c.bf16 %v528_v41, %v526_v35  ;;  %v411_v44 = vpop.f32.mrf.mxu0  ;;  %v451_v45 = vpop.f32.mrf.mxu1 }
  0xf0   :  { %1378 = vst [vmem:[#allocation2 + $0xa8] sm:$0xff] %v1301_v42  }
  0xf1   :  { %1386 = vst [vmem:[#allocation2 + $0xe8] sm:$0xff] %v1341_v43  }
  0xf5   :  { %v491_v51 = vpop.f32.mrf.mxu2  ;;  %v531_v52 = vpop.f32.mrf.mxu3 }
  0xf6   :  { %v413_v53 = vpop.f32.mrf.mxu0  ;;  %v453_v54 = vpop.f32.mrf.mxu1 }
  0xf7   :  { %v1226_v55 = vpack.c.bf16 %v413_v53, %v411_v44  ;;  %v1266_v56 = vpack.c.bf16 %v453_v54, %v451_v45 }
  0xf9   :  { %1363 = vst [vmem:[#allocation2 + $0x30] sm:$0xff] %v1226_v55  }
  0xfa   :  { %1371 = vst [vmem:[#allocation2 + $0x70] sm:$0xff] %v1266_v56  }
  0xfd   :  { %v493_v57 = vpop.f32.mrf.mxu2  ;;  %v533_v58 = vpop.f32.mrf.mxu3 }
  0xfe   :  { %v1306_v59 = vpack.c.bf16 %v493_v57, %v491_v51  ;;  %v1346_v60 = vpack.c.bf16 %v533_v58, %v531_v52  ;;  %v416_v61 = vpop.f32.mrf.mxu0  ;;  %v456_v62 = vpop.f32.mrf.mxu1 }
 0x100   :  { %1379 = vst [vmem:[#allocation2 + $0xb0] sm:$0xff] %v1306_v59  }
 0x101   :  { %1387 = vst [vmem:[#allocation2 + $0xf0] sm:$0xff] %v1346_v60  }
 0x105   :  { %v496_v63 = vpop.f32.mrf.mxu2  ;;  %v536_v0 = vpop.f32.mrf.mxu3 }
 0x106   :  { %v418_v1 = vpop.f32.mrf.mxu0  ;;  %v458_v2 = vpop.f32.mrf.mxu1 }
 0x107   :  { %v1231_v3 = vpack.c.bf16 %v418_v1, %v416_v61  ;;  %v1271_v4 = vpack.c.bf16 %v458_v2, %v456_v62 }
 0x109   :  { %1364 = vst [vmem:[#allocation2 + $0x38] sm:$0xff] %v1231_v3  }
 0x10a   :  { %1372 = vst [vmem:[#allocation2 + $0x78] sm:$0xff] %v1271_v4  }
 0x10d   :  { %v498_v5 = vpop.f32.mrf.mxu2  ;;  %v538_v6 = vpop.f32.mrf.mxu3 }
 0x10e   :  { %v1311_v7 = vpack.c.bf16 %v498_v5, %v496_v63  ;;  %v1351_v8 = vpack.c.bf16 %v538_v6, %v536_v0 }
 0x110   :  { %1380 = vst [vmem:[#allocation2 + $0xb8] sm:$0xff] %v1311_v7  }
 0x111   :  { %1388 = vst [vmem:[#allocation2 + $0xf8] sm:$0xff] %v1351_v8  }
 0x112 LB: > { %s1062_s3 = sshll.u32 %s1445_s2, 8  ;;  %v1067_v25 = vor.u32 %v1633_v49, %v1623_v47  ;;  %v1071_v26 = vor.u32 %v1618_v46, %v1628_v48  ;;  %s1192_s18 = sshll.u32 %s1445_s2, 3  ;;  %s1445_s2 = sphi %s1640_s2, %s680_s2  }
 0x113   : > { %s682_s15 = sshra.s32 %s1062_s3, 3  ;;  %s856_s19 = scalar_lea.vmem [#allocation3], %s1192_s18 }
 0x114   : > { %s1063_s16 = sshll.u32 %s682_s15, 2  ;;  %s680_s2 = sadd.s32 1, %s1445_s2  }
 0x115   : > { %s685_s17 = scalar_lea.vmem [#allocation2], %s1063_s16  ;;  %p677_p0 = scmp.ge.s32.totalorder %s680_s2, 2  }
 0x116   :  { %s865_s22 = sshll.u32 (%p677_p0), %s1663_s4, 4  ;;  %s1447_s23 = smov (%p677_p0), [#allocation3]   ;;  %s866_s22 = int_to_ptr.hbm [resolvable:$true] %s865_s22 }
 0x117   :  { %s863_s24 = sshll.u32 (%p677_p0), %s1447_s23, 4  ;;  %s1448_s25 = smov (%p677_p0), 64   ;;  %s864_s24 = int_to_ptr.vmem [resolvable:$true] %s863_s24 }
 0x118   : > { %v1183_v9 = vld [vmem:[%s685_s17 + $0x38] sm:$0xff]  ;;  %v1182_v11 = vld [vmem:[%s685_s17 + $0x30] sm:$0xff]  ;;  %v1181_v13 = vld [vmem:[%s685_s17 + $0x28] sm:$0xff]  ;;  %s1449_s26 = smov (%p677_p0), 4  }
 0x119   : > { %v1191_v10 = vld [vmem:[%s685_s17 + $0x78] sm:$0xff]  ;;  %824 = vmatpush.bf16.msra.mxu0 %v1183_v9  ;;  %v1190_v12 = vld [vmem:[%s685_s17 + $0x70] sm:$0xff]  ;;  %v1189_v14 = vld [vmem:[%s685_s17 + $0x68] sm:$0xff] }
 0x11a   : > { %838 = vmatpush.bf16.msra.mxu1 %v1191_v10  ;;  %v1180_v15 = vld [vmem:[%s685_s17 + $0x20] sm:$0xff]  ;;  %v1179_v17 = vld [vmem:[%s685_s17 + $0x18] sm:$0xff]  ;;  %v1178_v19 = vld [vmem:[%s685_s17 + $0x10] sm:$0xff] }
 0x11b   : > { %v1188_v16 = vld [vmem:[%s685_s17 + $0x60] sm:$0xff]  ;;  %v1187_v18 = vld [vmem:[%s685_s17 + $0x58] sm:$0xff]  ;;  %v1186_v20 = vld [vmem:[%s685_s17 + $0x50] sm:$0xff] }
 0x11c   : > { %v1177_v21 = vld [vmem:[%s685_s17 + $0x8] sm:$0xff]  ;;  %v1176_v23 = vld [vmem:[%s685_s17] sm:$0xff] }
 0x11d   : > { %825 = vmatpush.bf16.msra.mxu0 %v1182_v11  ;;  %v1185_v22 = vld [vmem:[%s685_s17 + $0x48] sm:$0xff]  ;;  %v1184_v24 = vld [vmem:[%s685_s17 + $0x40] sm:$0xff] }
 0x11e   : > { %839 = vmatpush.bf16.msra.mxu1 %v1190_v12 }
 0x121   : > { %826 = vmatpush.bf16.msra.mxu0 %v1181_v13 }
 0x122   : > { %840 = vmatpush.bf16.msra.mxu1 %v1189_v14 }
 0x125   : > { %827 = vmatpush.bf16.msra.mxu0 %v1180_v15 }
 0x126   : > { %841 = vmatpush.bf16.msra.mxu1 %v1188_v16 }
 0x129   : > { %828 = vmatpush.bf16.msra.mxu0 %v1179_v17 }
 0x12a   : > { %842 = vmatpush.bf16.msra.mxu1 %v1187_v18 }
 0x12d   : > { %829 = vmatpush.bf16.msra.mxu0 %v1178_v19 }
 0x12e   : > { %843 = vmatpush.bf16.msra.mxu1 %v1186_v20 }
 0x131   : > { %830 = vmatpush.bf16.msra.mxu0 %v1177_v21 }
 0x132   : > { %844 = vmatpush.bf16.msra.mxu1 %v1185_v22 }
 0x135   : > { %831 = vmatpush.bf16.msra.mxu0 %v1176_v23 }
 0x136   : > { %845 = vmatpush.bf16.msra.mxu1 %v1184_v24 }
 0x138   : > { %832 = vmatmul.bf16.vlgmr.msra.gmra.mxu0 %v1067_v25 }
 0x139   : > { %846 = vmatmul.bf16.vlgmr.msra.gmra.mxu1 %v1071_v26 }
 0x1b5   : > { %v833_v27 = vpop.f32.mrf.mxu0 }
 0x1b6   : > { %v847_v28 = vpop.f32.mrf.mxu1  ;;  %v834_v29 = vadd.f32 %v1638_v50, %v833_v27 }
 0x1b8   : > { %v848_v33 = vadd.f32 %v847_v28, %v834_v29 }
 0x1bd   : > { %v835_v30 = vpop.f32.mrf.mxu0 }
 0x1be   : > { %v836_v31 = vadd.f32 %v1638_v50, %v835_v30  ;;  %v849_v32 = vpop.f32.mrf.mxu1 }
 0x1c0   : > { %v850_v34 = vadd.f32 %v849_v32, %v836_v31  ;;  %679 = sbr.rel (!%p677_p0) target bundleno = 274 (0x112), region = 45 }
 0x1c2   : > { %v1356_v35 = vpack.c.bf16 %v850_v34, %v848_v33 }
 0x1c4   : > { %1357 = vst [vmem:[%s856_s19] sm:$0xff] %v1356_v35  }
 0x1c5   :  { %871 = dma.vmem_to_hbm [thread:$0]  %s864_s24, 256, %s866_s22, [#allocation4], %s1448_s25, %s1448_s25, %s1449_s26  }
 0x1c6   :  { %1441 = dma.done.wait [#allocation4], 256  }
 0x1c7   :  { %1442 = vsyncadd [#allocation4], 4294967040 }
 0x1c8   :  { %876 = vsyncpa [#allocation4], 1 }

// kernel: tpu_custom_call.1
= control target key start
LH: loop header
LB: loop body
LE: loop exit
PB: predicated region body
PF: predicated region fallthrough
CT: control target
= control target key end

     0   :  { %9 = vsyncpa [#allocation4], 0  ;;  %vm275_vm0 = vcmask 523264   ;;  %s1659_s0 = inlined_call_operand.vmem [shape: bf16[512,64], index: 0, kind: input, shape index: {}]   ;;  %s1660_s1 = inlined_call_operand.vmem [shape: bf16[64,128], index: 1, kind: input, shape index: {}]   ;;  %s1661_s2 = inlined_call_operand.vmem [shape: bf16[16,256], index: 2, kind: input, shape index: {}]   ;;  %s1662_s3 = inlined_call_operand.vmem [shape: f32[1,128], index: 3, kind: input, shape index: {}]   ;;  %s1663_s4 = inlined_call_operand.hbm [shape: bf16[2,16,128], index: 4, kind: output, shape index: {}]  }
   0x1   :  { %v1173_v0 = vld [vmem:[%s1660_s1 + $0x18] sm:$0xff]  ;;  %v1172_v1 = vld [vmem:[%s1660_s1 + $0x10] sm:$0xff]  ;;  %v1171_v2 = vld [vmem:[%s1660_s1 + $0x8] sm:$0xff] }
   0x2   :  { %376 = vmatpush.bf16.msra.mxu0 %v1173_v0  ;;  %1389 = vmatpush.bf16.msra.mxu1 %v1173_v0  ;;  %v1170_v3 = vld [vmem:[%s1660_s1] sm:$0xff]  ;;  %v1139_v8 = vld [vmem:[%s1659_s0 + $0x8] sm:$0xff]  ;;  %v1140_v12 = vld [vmem:[%s1659_s0 + $0x10] sm:$0xff] }
   0x3   :  { %1390 = vmatpush.bf16.msra.mxu2 %v1173_v0  ;;  %1391 = vmatpush.bf16.msra.mxu3 %v1173_v0  ;;  %v1138_v4 = vld [vmem:[%s1659_s0] sm:$0xff]  ;;  %v1147_v9 = vld [vmem:[%s1659_s0 + $0x48] sm:$0xff]  ;;  %v1148_v13 = vld [vmem:[%s1659_s0 + $0x50] sm:$0xff] }
   0x4   :  { %v1146_v5 = vld [vmem:[%s1659_s0 + $0x40] sm:$0xff]  ;;  %v1155_v10 = vld [vmem:[%s1659_s0 + $0x88] sm:$0xff]  ;;  %v1156_v14 = vld [vmem:[%s1659_s0 + $0x90] sm:$0xff] }
   0x5   :  { %v1154_v6 = vld [vmem:[%s1659_s0 + $0x80] sm:$0xff]  ;;  %v1163_v11 = vld [vmem:[%s1659_s0 + $0xc8] sm:$0xff]  ;;  %v1164_v15 = vld [vmem:[%s1659_s0 + $0xd0] sm:$0xff] }
   0x6   :  { %377 = vmatpush.bf16.msra.mxu0 %v1172_v1  ;;  %1392 = vmatpush.bf16.msra.mxu1 %v1172_v1  ;;  %v1162_v7 = vld [vmem:[%s1659_s0 + $0xc0] sm:$0xff]  ;;  %v1141_v16 = vld [vmem:[%s1659_s0 + $0x18] sm:$0xff]  ;;  %v1143_v24 = vld [vmem:[%s1659_s0 + $0x28] sm:$0xff] }
   0x7   :  { %1393 = vmatpush.bf16.msra.mxu2 %v1172_v1  ;;  %1394 = vmatpush.bf16.msra.mxu3 %v1172_v1  ;;  %v1149_v17 = vld [vmem:[%s1659_s0 + $0x58] sm:$0xff]  ;;  %v1142_v20 = vld [vmem:[%s1659_s0 + $0x20] sm:$0xff]  ;;  %v1151_v25 = vld [vmem:[%s1659_s0 + $0x68] sm:$0xff] }
   0x8   :  { %v1157_v18 = vld [vmem:[%s1659_s0 + $0x98] sm:$0xff]  ;;  %v1150_v21 = vld [vmem:[%s1659_s0 + $0x60] sm:$0xff]  ;;  %v1159_v26 = vld [vmem:[%s1659_s0 + $0xa8] sm:$0xff] }
   0x9   :  { %v1165_v19 = vld [vmem:[%s1659_s0 + $0xd8] sm:$0xff]  ;;  %v1158_v22 = vld [vmem:[%s1659_s0 + $0xa0] sm:$0xff]  ;;  %v1167_v27 = vld [vmem:[%s1659_s0 + $0xe8] sm:$0xff] }
   0xa   :  { %378 = vmatpush.bf16.msra.mxu0 %v1171_v2  ;;  %1395 = vmatpush.bf16.msra.mxu1 %v1171_v2  ;;  %v1166_v23 = vld [vmem:[%s1659_s0 + $0xe0] sm:$0xff]  ;;  %v1144_v28 = vld [vmem:[%s1659_s0 + $0x30] sm:$0xff]  ;;  %v1145_v32 = vld [vmem:[%s1659_s0 + $0x38] sm:$0xff] }
   0xb   :  { %1396 = vmatpush.bf16.msra.mxu2 %v1171_v2  ;;  %1397 = vmatpush.bf16.msra.mxu3 %v1171_v2  ;;  %v1152_v29 = vld [vmem:[%s1659_s0 + $0x70] sm:$0xff]  ;;  %v1153_v33 = vld [vmem:[%s1659_s0 + $0x78] sm:$0xff] }
   0xc   :  { %v1160_v30 = vld [vmem:[%s1659_s0 + $0xb0] sm:$0xff]  ;;  %v1161_v34 = vld [vmem:[%s1659_s0 + $0xb8] sm:$0xff] }
   0xd   :  { %v1168_v31 = vld [vmem:[%s1659_s0 + $0xf0] sm:$0xff]  ;;  %v1169_v35 = vld [vmem:[%s1659_s0 + $0xf8] sm:$0xff] }
   0xe   :  { %379 = vmatpush.bf16.msra.mxu0 %v1170_v3  ;;  %1398 = vmatpush.bf16.msra.mxu1 %v1170_v3 }
   0xf   :  { %1399 = vmatpush.bf16.msra.mxu2 %v1170_v3  ;;  %1400 = vmatpush.bf16.msra.mxu3 %v1170_v3 }
  0x11   :  { %1030 = vmatmul.msk.bf16.vlgmr.msra.gmra.mxu0 %vm275_vm0, %v1138_v4  ;;  %1038 = vmatmul.msk.bf16.vlgmr.msra.gmra.mxu1 %vm275_vm0, %v1146_v5 }
  0x12   :  { %1046 = vmatmul.msk.bf16.vlgmr.msra.gmra.mxu2 %vm275_vm0, %v1154_v6  ;;  %1054 = vmatmul.msk.bf16.vlgmr.msra.gmra.mxu3 %vm275_vm0, %v1162_v7 }
  0x21   :  { %1031 = vmatmul.msk.bf16.gmra.mxu0 %vm275_vm0, %v1139_v8  ;;  %1039 = vmatmul.msk.bf16.gmra.mxu1 %vm275_vm0, %v1147_v9 }
  0x22   :  { %1047 = vmatmul.msk.bf16.gmra.mxu2 %vm275_vm0, %v1155_v10  ;;  %1055 = vmatmul.msk.bf16.gmra.mxu3 %vm275_vm0, %v1163_v11 }
  0x31   :  { %1032 = vmatmul.msk.bf16.gmra.mxu0 %vm275_vm0, %v1140_v12  ;;  %1040 = vmatmul.msk.bf16.gmra.mxu1 %vm275_vm0, %v1148_v13 }
  0x32   :  { %1048 = vmatmul.msk.bf16.gmra.mxu2 %vm275_vm0, %v1156_v14  ;;  %1056 = vmatmul.msk.bf16.gmra.mxu3 %vm275_vm0, %v1164_v15 }
  0x41   :  { %1033 = vmatmul.msk.bf16.gmra.mxu0 %vm275_vm0, %v1141_v16  ;;  %1041 = vmatmul.msk.bf16.gmra.mxu1 %vm275_vm0, %v1149_v17 }
  0x42   :  { %1049 = vmatmul.msk.bf16.gmra.mxu2 %vm275_vm0, %v1157_v18  ;;  %1057 = vmatmul.msk.bf16.gmra.mxu3 %vm275_vm0, %v1165_v19 }
  0x51   :  { %1034 = vmatmul.msk.bf16.gmra.mxu0 %vm275_vm0, %v1142_v20  ;;  %1042 = vmatmul.msk.bf16.gmra.mxu1 %vm275_vm0, %v1150_v21 }
  0x52   :  { %1050 = vmatmul.msk.bf16.gmra.mxu2 %vm275_vm0, %v1158_v22  ;;  %1058 = vmatmul.msk.bf16.gmra.mxu3 %vm275_vm0, %v1166_v23 }
  0x61   :  { %1035 = vmatmul.msk.bf16.gmra.mxu0 %vm275_vm0, %v1143_v24  ;;  %1043 = vmatmul.msk.bf16.gmra.mxu1 %vm275_vm0, %v1151_v25 }
  0x62   :  { %1051 = vmatmul.msk.bf16.gmra.mxu2 %vm275_vm0, %v1159_v26  ;;  %1059 = vmatmul.msk.bf16.gmra.mxu3 %vm275_vm0, %v1167_v27 }
  0x71   :  { %1036 = vmatmul.msk.bf16.gmra.mxu0 %vm275_vm0, %v1144_v28  ;;  %1044 = vmatmul.msk.bf16.gmra.mxu1 %vm275_vm0, %v1152_v29 }
  0x72   :  { %1052 = vmatmul.msk.bf16.gmra.mxu2 %vm275_vm0, %v1160_v30  ;;  %1060 = vmatmul.msk.bf16.gmra.mxu3 %vm275_vm0, %v1168_v31 }
  0x81   :  { %1037 = vmatmul.msk.bf16.gmra.mxu0 %vm275_vm0, %v1145_v32  ;;  %1045 = vmatmul.msk.bf16.gmra.mxu1 %vm275_vm0, %v1153_v33 }
  0x82   :  { %1053 = vmatmul.msk.bf16.gmra.mxu2 %vm275_vm0, %v1161_v34  ;;  %1061 = vmatmul.msk.bf16.gmra.mxu3 %vm275_vm0, %v1169_v35 }
  0x8e   :  { %v381_v36 = vpop.f32.mrf.mxu0  ;;  %v421_v37 = vpop.f32.mrf.mxu1 }
  0x95   :  { %v461_v38 = vpop.f32.mrf.mxu2  ;;  %v501_v39 = vpop.f32.mrf.mxu3 }
  0x96   :  { %v383_v40 = vpop.f32.mrf.mxu0  ;;  %v423_v41 = vpop.f32.mrf.mxu1 }
  0x97   :  { %v1196_v42 = vpack.c.bf16 %v383_v40, %v381_v36  ;;  %v1236_v43 = vpack.c.bf16 %v423_v41, %v421_v37 }
  0x99   :  { %1197 = vst [vmem:[#allocation2] sm:$0xff] %v1196_v42  }
  0x9a   :  { %1365 = vst [vmem:[#allocation2 + $0x40] sm:$0xff] %v1236_v43  }
  0x9d   :  { %v463_v44 = vpop.f32.mrf.mxu2  ;;  %v503_v45 = vpop.f32.mrf.mxu3 }
  0x9e   :  { %v1276_v46 = vpack.c.bf16 %v463_v44, %v461_v38  ;;  %v1316_v47 = vpack.c.bf16 %v503_v45, %v501_v39  ;;  %v386_v48 = vpop.f32.mrf.mxu0  ;;  %v426_v49 = vpop.f32.mrf.mxu1 }
  0xa0   :  { %1373 = vst [vmem:[#allocation2 + $0x80] sm:$0xff] %v1276_v46   ;;  %v1618_v46 = vld [vmem:[%s1661_s2 + $0x4] sm:$0xf] }
  0xa1   :  { %1381 = vst [vmem:[#allocation2 + $0xc0] sm:$0xff] %v1316_v47   ;;  %v1623_v47 = vld [vmem:[%s1661_s2] sm:$0xf] }
  0xa5   :  { %v466_v50 = vpop.f32.mrf.mxu2  ;;  %v506_v51 = vpop.f32.mrf.mxu3 }
  0xa6   :  { %v388_v52 = vpop.f32.mrf.mxu0  ;;  %v428_v53 = vpop.f32.mrf.mxu1 }
  0xa7   :  { %v1201_v54 = vpack.c.bf16 %v388_v52, %v386_v48  ;;  %v1241_v55 = vpack.c.bf16 %v428_v53, %v426_v49  ;;  %v1628_v48 = vld [vmem:[%s1661_s2 + $0x8] sm:$0xf0]  ;;  %v1633_v49 = vld [vmem:[%s1661_s2 + $0x4] sm:$0xf0]  ;;  %s1640_s2 = smov 0  }
  0xa9   :  { %1358 = vst [vmem:[#allocation2 + $0x8] sm:$0xff] %v1201_v54  }
  0xaa   :  { %1366 = vst [vmem:[#allocation2 + $0x48] sm:$0xff] %v1241_v55  }
  0xad   :  { %v468_v56 = vpop.f32.mrf.mxu2  ;;  %v508_v57 = vpop.f32.mrf.mxu3 }
  0xae   :  { %v1281_v58 = vpack.c.bf16 %v468_v56, %v466_v50  ;;  %v1321_v59 = vpack.c.bf16 %v508_v57, %v506_v51  ;;  %v391_v60 = vpop.f32.mrf.mxu0  ;;  %v431_v61 = vpop.f32.mrf.mxu1  ;;  %v1638_v50 = vld [vmem:[%s1662_s3] ss:$0 sm:$0xff] }
  0xb0   :  { %1374 = vst [vmem:[#allocation2 + $0x88] sm:$0xff] %v1281_v58  }
  0xb1   :  { %1382 = vst [vmem:[#allocation2 + $0xc8] sm:$0xff] %v1321_v59  }
  0xb5   :  { %v471_v62 = vpop.f32.mrf.mxu2  ;;  %v511_v63 = vpop.f32.mrf.mxu3 }
  0xb6   :  { %v393_v0 = vpop.f32.mrf.mxu0  ;;  %v433_v1 = vpop.f32.mrf.mxu1 }
  0xb7   :  { %v1206_v2 = vpack.c.bf16 %v393_v0, %v391_v60  ;;  %v1246_v3 = vpack.c.bf16 %v433_v1, %v431_v61 }
  0xb9   :  { %1359 = vst [vmem:[#allocation2 + $0x10] sm:$0xff] %v1206_v2  }
  0xba   :  { %1367 = vst [vmem:[#allocation2 + $0x50] sm:$0xff] %v1246_v3  }
  0xbd   :  { %v473_v4 = vpop.f32.mrf.mxu2  ;;  %v513_v5 = vpop.f32.mrf.mxu3 }
  0xbe   :  { %v1286_v6 = vpack.c.bf16 %v473_v4, %v471_v62  ;;  %v1326_v7 = vpack.c.bf16 %v513_v5, %v511_v63  ;;  %v396_v8 = vpop.f32.mrf.mxu0  ;;  %v436_v9 = vpop.f32.mrf.mxu1 }
  0xc0   :  { %1375 = vst [vmem:[#allocation2 + $0x90] sm:$0xff] %v1286_v6  }
  0xc1   :  { %1383 = vst [vmem:[#allocation2 + $0xd0] sm:$0xff] %v1326_v7  }
  0xc5   :  { %v476_v10 = vpop.f32.mrf.mxu2  ;;  %v516_v11 = vpop.f32.mrf.mxu3 }
  0xc6   :  { %v398_v12 = vpop.f32.mrf.mxu0  ;;  %v438_v13 = vpop.f32.mrf.mxu1 }
  0xc7   :  { %v1211_v14 = vpack.c.bf16 %v398_v12, %v396_v8  ;;  %v1251_v15 = vpack.c.bf16 %v438_v13, %v436_v9 }
  0xc9   :  { %1360 = vst [vmem:[#allocation2 + $0x18] sm:$0xff] %v1211_v14  }
  0xca   :  { %1368 = vst [vmem:[#allocation2 + $0x58] sm:$0xff] %v1251_v15  }
  0xcd   :  { %v478_v16 = vpop.f32.mrf.mxu2  ;;  %v518_v17 = vpop.f32.mrf.mxu3 }
  0xce   :  { %v1291_v18 = vpack.c.bf16 %v478_v16, %v476_v10  ;;  %v1331_v19 = vpack.c.bf16 %v518_v17, %v516_v11  ;;  %v401_v20 = vpop.f32.mrf.mxu0  ;;  %v441_v21 = vpop.f32.mrf.mxu1 }
  0xd0   :  { %1376 = vst [vmem:[#allocation2 + $0x98] sm:$0xff] %v1291_v18  }
  0xd1   :  { %1384 = vst [vmem:[#allocation2 + $0xd8] sm:$0xff] %v1331_v19  }
  0xd5   :  { %v481_v22 = vpop.f32.mrf.mxu2  ;;  %v521_v23 = vpop.f32.mrf.mxu3 }
  0xd6   :  { %v403_v24 = vpop.f32.mrf.mxu0  ;;  %v443_v25 = vpop.f32.mrf.mxu1 }
  0xd7   :  { %v1216_v26 = vpack.c.bf16 %v403_v24, %v401_v20  ;;  %v1256_v27 = vpack.c.bf16 %v443_v25, %v441_v21 }
  0xd9   :  { %1361 = vst [vmem:[#allocation2 + $0x20] sm:$0xff] %v1216_v26  }
  0xda   :  { %1369 = vst [vmem:[#allocation2 + $0x60] sm:$0xff] %v1256_v27  }
  0xdd   :  { %v483_v28 = vpop.f32.mrf.mxu2  ;;  %v523_v29 = vpop.f32.mrf.mxu3 }
  0xde   :  { %v1296_v30 = vpack.c.bf16 %v483_v28, %v481_v22  ;;  %v1336_v31 = vpack.c.bf16 %v523_v29, %v521_v23  ;;  %v406_v32 = vpop.f32.mrf.mxu0  ;;  %v446_v33 = vpop.f32.mrf.mxu1 }
  0xe0   :  { %1377 = vst [vmem:[#allocation2 + $0xa0] sm:$0xff] %v1296_v30  }
  0xe1   :  { %1385 = vst [vmem:[#allocation2 + $0xe0] sm:$0xff] %v1336_v31  }
  0xe5   :  { %v486_v34 = vpop.f32.mrf.mxu2  ;;  %v526_v35 = vpop.f32.mrf.mxu3 }
  0xe6   :  { %v408_v36 = vpop.f32.mrf.mxu0  ;;  %v448_v37 = vpop.f32.mrf.mxu1 }
  0xe7   :  { %v1221_v38 = vpack.c.bf16 %v408_v36, %v406_v32  ;;  %v1261_v39 = vpack.c.bf16 %v448_v37, %v446_v33 }
  0xe9   :  { %1362 = vst [vmem:[#allocation2 + $0x28] sm:$0xff] %v1221_v38  }
  0xea   :  { %1370 = vst [vmem:[#allocation2 + $0x68] sm:$0xff] %v1261_v39  }
  0xed   :  { %v488_v40 = vpop.f32.mrf.mxu2  ;;  %v528_v41 = vpop.f32.mrf.mxu3 }
  0xee   :  { %v1301_v42 = vpack.c.bf16 %v488_v40, %v486_v34  ;;  %v1341_v43 = vpack.c.bf16 %v528_v41, %v526_v35  ;;  %v411_v44 = vpop.f32.mrf.mxu0  ;;  %v451_v45 = vpop.f32.mrf.mxu1 }
  0xf0   :  { %1378 = vst [vmem:[#allocation2 + $0xa8] sm:$0xff] %v1301_v42  }
  0xf1   :  { %1386 = vst [vmem:[#allocation2 + $0xe8] sm:$0xff] %v1341_v43  }
  0xf5   :  { %v491_v51 = vpop.f32.mrf.mxu2  ;;  %v531_v52 = vpop.f32.mrf.mxu3 }
  0xf6   :  { %v413_v53 = vpop.f32.mrf.mxu0  ;;  %v453_v54 = vpop.f32.mrf.mxu1 }
  0xf7   :  { %v1226_v55 = vpack.c.bf16 %v413_v53, %v411_v44  ;;  %v1266_v56 = vpack.c.bf16 %v453_v54, %v451_v45 }
  0xf9   :  { %1363 = vst [vmem:[#allocation2 + $0x30] sm:$0xff] %v1226_v55  }
  0xfa   :  { %1371 = vst [vmem:[#allocation2 + $0x70] sm:$0xff] %v1266_v56  }
  0xfd   :  { %v493_v57 = vpop.f32.mrf.mxu2  ;;  %v533_v58 = vpop.f32.mrf.mxu3 }
  0xfe   :  { %v1306_v59 = vpack.c.bf16 %v493_v57, %v491_v51  ;;  %v1346_v60 = vpack.c.bf16 %v533_v58, %v531_v52  ;;  %v416_v61 = vpop.f32.mrf.mxu0  ;;  %v456_v62 = vpop.f32.mrf.mxu1 }
 0x100   :  { %1379 = vst [vmem:[#allocation2 + $0xb0] sm:$0xff] %v1306_v59  }
 0x101   :  { %1387 = vst [vmem:[#allocation2 + $0xf0] sm:$0xff] %v1346_v60  }
 0x105   :  { %v496_v63 = vpop.f32.mrf.mxu2  ;;  %v536_v0 = vpop.f32.mrf.mxu3 }
 0x106   :  { %v418_v1 = vpop.f32.mrf.mxu0  ;;  %v458_v2 = vpop.f32.mrf.mxu1 }
 0x107   :  { %v1231_v3 = vpack.c.bf16 %v418_v1, %v416_v61  ;;  %v1271_v4 = vpack.c.bf16 %v458_v2, %v456_v62 }
 0x109   :  { %1364 = vst [vmem:[#allocation2 + $0x38] sm:$0xff] %v1231_v3  }
 0x10a   :  { %1372 = vst [vmem:[#allocation2 + $0x78] sm:$0xff] %v1271_v4  }
 0x10d   :  { %v498_v5 = vpop.f32.mrf.mxu2  ;;  %v538_v6 = vpop.f32.mrf.mxu3 }
 0x10e   :  { %v1311_v7 = vpack.c.bf16 %v498_v5, %v496_v63  ;;  %v1351_v8 = vpack.c.bf16 %v538_v6, %v536_v0 }
 0x110   :  { %1380 = vst [vmem:[#allocation2 + $0xb8] sm:$0xff] %v1311_v7  }
 0x111   :  { %1388 = vst [vmem:[#allocation2 + $0xf8] sm:$0xff] %v1351_v8  }
 0x112 LB: > { %s1062_s3 = sshll.u32 %s1445_s2, 8  ;;  %v1067_v25 = vor.u32 %v1633_v49, %v1623_v47  ;;  %v1071_v26 = vor.u32 %v1618_v46, %v1628_v48  ;;  %s1192_s18 = sshll.u32 %s1445_s2, 3  ;;  %s1445_s2 = sphi %s1640_s2, %s680_s2  }
 0x113   : > { %s682_s15 = sshra.s32 %s1062_s3, 3  ;;  %s856_s19 = scalar_lea.vmem [#allocation3], %s1192_s18 }
 0x114   : > { %s1063_s16 = sshll.u32 %s682_s15, 2  ;;  %s680_s2 = sadd.s32 1, %s1445_s2  }
 0x115   : > { %s685_s17 = scalar_lea.vmem [#allocation2], %s1063_s16  ;;  %p677_p0 = scmp.ge.s32.totalorder %s680_s2, 2  }
 0x116   :  { %s865_s22 = sshll.u32 (%p677_p0), %s1663_s4, 4  ;;  %s1447_s23 = smov (%p677_p0), [#allocation3]   ;;  %s866_s22 = int_to_ptr.hbm [resolvable:$true] %s865_s22 }
 0x117   :  { %s863_s24 = sshll.u32 (%p677_p0), %s1447_s23, 4  ;;  %s1448_s25 = smov (%p677_p0), 64   ;;  %s864_s24 = int_to_ptr.vmem [resolvable:$true] %s863_s24 }
 0x118   : > { %v1183_v9 = vld [vmem:[%s685_s17 + $0x38] sm:$0xff]  ;;  %v1182_v11 = vld [vmem:[%s685_s17 + $0x30] sm:$0xff]  ;;  %v1181_v13 = vld [vmem:[%s685_s17 + $0x28] sm:$0xff]  ;;  %s1449_s26 = smov (%p677_p0), 4  }
 0x119   : > { %v1191_v10 = vld [vmem:[%s685_s17 + $0x78] sm:$0xff]  ;;  %824 = vmatpush.bf16.msra.mxu0 %v1183_v9  ;;  %v1190_v12 = vld [vmem:[%s685_s17 + $0x70] sm:$0xff]  ;;  %v1189_v14 = vld [vmem:[%s685_s17 + $0x68] sm:$0xff] }
 0x11a   : > { %838 = vmatpush.bf16.msra.mxu1 %v1191_v10  ;;  %v1180_v15 = vld [vmem:[%s685_s17 + $0x20] sm:$0xff]  ;;  %v1179_v17 = vld [vmem:[%s685_s17 + $0x18] sm:$0xff]  ;;  %v1178_v19 = vld [vmem:[%s685_s17 + $0x10] sm:$0xff] }
 0x11b   : > { %v1188_v16 = vld [vmem:[%s685_s17 + $0x60] sm:$0xff]  ;;  %v1187_v18 = vld [vmem:[%s685_s17 + $0x58] sm:$0xff]  ;;  %v1186_v20 = vld [vmem:[%s685_s17 + $0x50] sm:$0xff] }
 0x11c   : > { %v1177_v21 = vld [vmem:[%s685_s17 + $0x8] sm:$0xff]  ;;  %v1176_v23 = vld [vmem:[%s685_s17] sm:$0xff] }
 0x11d   : > { %825 = vmatpush.bf16.msra.mxu0 %v1182_v11  ;;  %v1185_v22 = vld [vmem:[%s685_s17 + $0x48] sm:$0xff]  ;;  %v1184_v24 = vld [vmem:[%s685_s17 + $0x40] sm:$0xff] }
 0x11e   : > { %839 = vmatpush.bf16.msra.mxu1 %v1190_v12 }
 0x121   : > { %826 = vmatpush.bf16.msra.mxu0 %v1181_v13 }
 0x122   : > { %840 = vmatpush.bf16.msra.mxu1 %v1189_v14 }
 0x125   : > { %827 = vmatpush.bf16.msra.mxu0 %v1180_v15 }
 0x126   : > { %841 = vmatpush.bf16.msra.mxu1 %v1188_v16 }
 0x129   : > { %828 = vmatpush.bf16.msra.mxu0 %v1179_v17 }
 0x12a   : > { %842 = vmatpush.bf16.msra.mxu1 %v1187_v18 }
 0x12d   : > { %829 = vmatpush.bf16.msra.mxu0 %v1178_v19 }
 0x12e   : > { %843 = vmatpush.bf16.msra.mxu1 %v1186_v20 }
 0x131   : > { %830 = vmatpush.bf16.msra.mxu0 %v1177_v21 }
 0x132   : > { %844 = vmatpush.bf16.msra.mxu1 %v1185_v22 }
 0x135   : > { %831 = vmatpush.bf16.msra.mxu0 %v1176_v23 }
 0x136   : > { %845 = vmatpush.bf16.msra.mxu1 %v1184_v24 }
 0x138   : > { %832 = vmatmul.bf16.vlgmr.msra.gmra.mxu0 %v1067_v25 }
 0x139   : > { %846 = vmatmul.bf16.vlgmr.msra.gmra.mxu1 %v1071_v26 }
 0x1b5   : > { %v833_v27 = vpop.f32.mrf.mxu0 }
 0x1b6   : > { %v847_v28 = vpop.f32.mrf.mxu1  ;;  %v834_v29 = vadd.f32 %v1638_v50, %v833_v27 }
 0x1b8   : > { %v848_v33 = vadd.f32 %v847_v28, %v834_v29 }
 0x1bd   : > { %v835_v30 = vpop.f32.mrf.mxu0 }
 0x1be   : > { %v836_v31 = vadd.f32 %v1638_v50, %v835_v30  ;;  %v849_v32 = vpop.f32.mrf.mxu1 }
 0x1c0   : > { %v850_v34 = vadd.f32 %v849_v32, %v836_v31  ;;  %679 = sbr.rel (!%p677_p0) target bundleno = 274 (0x112), region = 45 }
 0x1c2   : > { %v1356_v35 = vpack.c.bf16 %v850_v34, %v848_v33 }
 0x1c4   : > { %1357 = vst [vmem:[%s856_s19] sm:$0xff] %v1356_v35  }
 0x1c5   :  { %871 = dma.vmem_to_hbm [thread:$0]  %s864_s24, 256, %s866_s22, [#allocation4], %s1448_s25, %s1448_s25, %s1449_s26  }
 0x1c6   :  { %1441 = dma.done.wait [#allocation4], 256  }
 0x1c7   :  { %1442 = vsyncadd [#allocation4], 4294967040 }
 0x1c8   :  { %876 = vsyncpa [#allocation4], 1 }

</bundles_post_ra>
